<compile_context>
chip_gen: v7x
topology: tpu7x:2x2x1
jax: 0.10.0
libtpu: 0.0.40
codegen_flags: <defaults>
</compile_context>

<pallas_src>
import functools
import math

import jax
import jax.numpy as jnp
from jax.experimental import pallas as pl
from jax.experimental.pallas import tpu as pltpu


def _policy_mlp_kernel(belief_ref, latent_ref, w1_ref, w2_ref, w3_ref, b_ref,
                       o_ref, *, belief_dim, hidden_dim):
    """Fused forward: Linear -> ReLU -> Linear -> ReLU -> Linear.

    The (belief, latent) concat is fused into the first layer as two MXU dots
    accumulated in f32; bias-add / ReLU run on the VPU; the packed bias row is
    split with static lane slices.
    """
    b = b_ref[...]                                   # (1, 2H + A) packed biases
    b1 = b[:, :hidden_dim]
    b2 = b[:, hidden_dim:2 * hidden_dim]
    b3 = b[:, 2 * hidden_dim:]

    w1 = w1_ref[...]                                 # (bd + ld, H)
    h1 = (jnp.dot(belief_ref[...], w1[:belief_dim, :],
                  preferred_element_type=jnp.float32)
          + jnp.dot(latent_ref[...], w1[belief_dim:, :],
                    preferred_element_type=jnp.float32)
          + b1)
    h1 = jnp.maximum(h1, 0.0)

    h2 = jnp.dot(h1, w2_ref[...], preferred_element_type=jnp.float32) + b2
    h2 = jnp.maximum(h2, 0.0)

    logits = jnp.dot(h2, w3_ref[...], preferred_element_type=jnp.float32) + b3
    o_ref[...] = logits.astype(o_ref.dtype)


def _round_up(x, m):
    return ((x + m - 1) // m) * m


@functools.partial(jax.jit, static_argnames=("block_b",))
def policy_mlp_pallas(belief, latent, w1, w2, w3, b_packed, *, block_b=256):
    """Batched, fused policy-MLP forward.

    grid = (ceil(B / bb),) over the batch dim, marked "parallel" so v7x shards
    it across both TensorCores; weight/bias blocks use a constant index_map so
    they stay resident in VMEM across grid steps (no re-DMA).
    """
    B, bd = belief.shape
    ld = latent.shape[1]
    H = w2.shape[0]
    A = w3.shape[1]

    # Batch tile: a single full-extent block for small batches (no padding
    # needed since block == full dim), otherwise block_b-row tiles.
    bb = B if B <= block_b else block_b
    Bp = _round_up(B, bb)
    if Bp != B:
        belief = jnp.pad(belief, ((0, Bp - B), (0, 0)))
        latent = jnp.pad(latent, ((0, Bp - B), (0, 0)))

    kernel = functools.partial(_policy_mlp_kernel,
                               belief_dim=bd, hidden_dim=H)
    out = pl.pallas_call(
        kernel,
        out_shape=jax.ShapeDtypeStruct((Bp, A), jnp.float32),
        grid=(Bp // bb,),
        in_specs=[
            pl.BlockSpec((bb, bd), lambda i: (i, 0)),        # belief tile
            pl.BlockSpec((bb, ld), lambda i: (i, 0)),        # latent tile
            pl.BlockSpec((bd + ld, H), lambda i: (0, 0)),    # W1 (resident)
            pl.BlockSpec((H, H), lambda i: (0, 0)),          # W2 (resident)
            pl.BlockSpec((H, A), lambda i: (0, 0)),          # W3 (resident)
            pl.BlockSpec((1, 2 * H + A), lambda i: (0, 0)),  # packed biases
        ],
        out_specs=pl.BlockSpec((bb, A), lambda i: (i, 0)),
        compiler_params=pltpu.CompilerParams(
            dimension_semantics=("parallel",)),
    )(belief, latent, w1, w2, w3, b_packed)
    return out[:B] if Bp != B else out


def init_policy_params(key, belief_dim, latent_dim, action_dim, hidden_dim):
    """Deterministic init mimicking nn.Linear's U(-1/sqrt(fan_in), 1/sqrt(fan_in)).

    Weights are stored (in_features, out_features) so y = x @ W + b matches
    torch.nn.Linear (W = W_torch.T). Biases are packed into one (1, 2H+A) row.
    """
    input_dim = belief_dim + latent_dim
    dims = [(input_dim, hidden_dim), (hidden_dim, hidden_dim),
            (hidden_dim, action_dim)]
    ws, bs = [], []
    for fan_in, fan_out in dims:
        key, kw, kb = jax.random.split(key, 3)
        bound = 1.0 / math.sqrt(fan_in)
        ws.append(jax.random.uniform(kw, (fan_in, fan_out), jnp.float32,
                                     -bound, bound))
        bs.append(jax.random.uniform(kb, (fan_out,), jnp.float32,
                                     -bound, bound))
    return {
        "w1": ws[0], "w2": ws[1], "w3": ws[2],
        "b_packed": jnp.concatenate(bs)[None, :],   # (1, 2H + A)
    }


def _fix_dims(belief, latent):
    """Mirrors PolicyNetwork.forward's squeeze/unsqueeze handling."""
    if belief.ndim == 3:
        belief = jnp.squeeze(belief, axis=0)
    if latent.ndim == 3:
        latent = jnp.squeeze(latent, axis=0)
    if belief.ndim == 1:
        belief = belief[None, :]
    if latent.ndim == 1:
        latent = latent[None, :]
    return belief, latent


def policy_network_forward(belief, latent, params, *, block_b=256):
    belief, latent = _fix_dims(belief, latent)
    return policy_mlp_pallas(belief, latent, params["w1"], params["w2"],
                             params["w3"], params["b_packed"], block_b=block_b)


def _reference_forward(belief, latent, params):
    """Pure-JAX reference for correctness checking."""
    belief, latent = _fix_dims(belief, latent)
    x = jnp.concatenate([belief, latent], axis=1)
    H = params["w2"].shape[0]
    b = params["b_packed"]
    b1, b2, b3 = b[:, :H], b[:, H:2 * H], b[:, 2 * H:]
    h1 = jnp.maximum(x @ params["w1"] + b1, 0.0)
    h2 = jnp.maximum(h1 @ params["w2"] + b2, 0.0)
    return h2 @ params["w3"] + b3


if __name__ == "__main__":
    belief_dim, latent_dim, action_dim, hidden_dim = 12, 20, 8, 32
    batch = 2

    key = jax.random.PRNGKey(0)
    key, kp, kb, kl = jax.random.split(key, 4)

    params = init_policy_params(kp, belief_dim, latent_dim, action_dim,
                                hidden_dim)
    belief = jax.random.normal(kb, (batch, belief_dim), jnp.float32)
    latent = jax.random.normal(kl, (batch, latent_dim), jnp.float32)

    logits = policy_network_forward(belief, latent, params)
    jax.block_until_ready(logits)
    ref = _reference_forward(belief, latent, params)
    assert logits.shape == (batch, action_dim)
    assert jnp.allclose(logits, ref, atol=1e-5, rtol=1e-5)

    # Exercise the tiled "parallel" grid path (multi-step grid + batch padding).
    batch2 = 50
    key, kb2, kl2 = jax.random.split(key, 3)
    belief2 = jax.random.normal(kb2, (batch2, belief_dim), jnp.float32)
    latent2 = jax.random.normal(kl2, (batch2, latent_dim), jnp.float32)
    logits2 = policy_network_forward(belief2, latent2, params, block_b=16)
    jax.block_until_ready(logits2)
    ref2 = _reference_forward(belief2, latent2, params)
    assert logits2.shape == (batch2, action_dim)
    assert jnp.allclose(logits2, ref2, atol=1e-5, rtol=1e-5)

    print("KERNEL_OK")
</pallas_src>

<mosaic_0001>
module attributes {stable_mosaic.version = 11 : i64} {
  func.func @_policy_mlp_kernel(%arg0: i32, %arg1: memref<2x12xf32, #tpu.memory_space<vmem>>, %arg2: memref<2x20xf32, #tpu.memory_space<vmem>>, %arg3: memref<32x32xf32, #tpu.memory_space<vmem>>, %arg4: memref<32x32xf32, #tpu.memory_space<vmem>>, %arg5: memref<32x8xf32, #tpu.memory_space<vmem>>, %arg6: memref<1x72xf32, #tpu.memory_space<vmem>>, %arg7: memref<2x8xf32, #tpu.memory_space<vmem>>) attributes {dimension_semantics = [#tpu.dimension_semantics<parallel>], iteration_bounds = array<i64: 1>, scalar_prefetch = 0 : i64, scratch_operands = 0 : i64, tpu.core_type = #tpu.core_type<tc>, window_params = [{transform_indices = @transform_0, window_bounds = array<i64: 2, 12>}, {transform_indices = @transform_1, window_bounds = array<i64: 2, 20>}, {pipeline_mode = #tpu.pipeline_mode<synchronous>, transform_indices = @transform_2, window_bounds = array<i64: 32, 32>}, {pipeline_mode = #tpu.pipeline_mode<synchronous>, transform_indices = @transform_3, window_bounds = array<i64: 32, 32>}, {pipeline_mode = #tpu.pipeline_mode<synchronous>, transform_indices = @transform_4, window_bounds = array<i64: 32, 8>}, {pipeline_mode = #tpu.pipeline_mode<synchronous>, transform_indices = @transform_5, window_bounds = array<i64: 1, 72>}, {transform_indices = @transform_6, window_bounds = array<i64: 2, 8>}]} {
    %c0 = arith.constant 0 : index
    %c0_0 = arith.constant 0 : index
    %0 = vector.load %arg6[%c0, %c0_0] : memref<1x72xf32, #tpu.memory_space<vmem>>, vector<1x72xf32>
    %1 = vector.extract_strided_slice %0 {offsets = [0, 0], sizes = [1, 32], strides = [1, 1]} : vector<1x72xf32> to vector<1x32xf32>
    %2 = vector.extract_strided_slice %0 {offsets = [0, 32], sizes = [1, 32], strides = [1, 1]} : vector<1x72xf32> to vector<1x32xf32>
    %3 = vector.extract_strided_slice %0 {offsets = [0, 64], sizes = [1, 8], strides = [1, 1]} : vector<1x72xf32> to vector<1x8xf32>
    %c0_1 = arith.constant 0 : index
    %c0_2 = arith.constant 0 : index
    %4 = vector.load %arg3[%c0_1, %c0_2] : memref<32x32xf32, #tpu.memory_space<vmem>>, vector<32x32xf32>
    %c0_3 = arith.constant 0 : index
    %c0_4 = arith.constant 0 : index
    %5 = vector.load %arg1[%c0_3, %c0_4] : memref<2x12xf32, #tpu.memory_space<vmem>>, vector<2x12xf32>
    %6 = vector.extract_strided_slice %4 {offsets = [0, 0], sizes = [12, 32], strides = [1, 1]} : vector<32x32xf32> to vector<12x32xf32>
    %cst = arith.constant dense<0.000000e+00> : vector<2x32xf32>
    %7 = tpu.matmul %5, %6, %cst {dimension_numbers = #tpu.dot_dimension_numbers<[1], [0], [0], [1], [0, 0, 1, 1], [], []>} : vector<2x12xf32>, vector<12x32xf32>, vector<2x32xf32> -> vector<2x32xf32>
    %c0_5 = arith.constant 0 : index
    %c0_6 = arith.constant 0 : index
    %8 = vector.load %arg2[%c0_5, %c0_6] : memref<2x20xf32, #tpu.memory_space<vmem>>, vector<2x20xf32>
    %9 = vector.extract_strided_slice %4 {offsets = [12, 0], sizes = [20, 32], strides = [1, 1]} : vector<32x32xf32> to vector<20x32xf32>
    %cst_7 = arith.constant dense<0.000000e+00> : vector<2x32xf32>
    %10 = tpu.matmul %8, %9, %cst_7 {dimension_numbers = #tpu.dot_dimension_numbers<[1], [0], [0], [1], [0, 0, 1, 1], [], []>} : vector<2x20xf32>, vector<20x32xf32>, vector<2x32xf32> -> vector<2x32xf32>
    %11 = arith.addf %7, %10 : vector<2x32xf32>
    %12 = vector.broadcast %1 : vector<1x32xf32> to vector<2x32xf32>
    %13 = arith.addf %11, %12 : vector<2x32xf32>
    %cst_8 = arith.constant 0.000000e+00 : f32
    %14 = vector.broadcast %cst_8 : f32 to vector<2x32xf32>
    %15 = arith.maximumf %13, %14 : vector<2x32xf32>
    %c0_9 = arith.constant 0 : index
    %c0_10 = arith.constant 0 : index
    %16 = vector.load %arg4[%c0_9, %c0_10] : memref<32x32xf32, #tpu.memory_space<vmem>>, vector<32x32xf32>
    %cst_11 = arith.constant dense<0.000000e+00> : vector<2x32xf32>
    %17 = tpu.matmul %15, %16, %cst_11 {dimension_numbers = #tpu.dot_dimension_numbers<[1], [0], [0], [1], [0, 0, 1, 1], [], []>} : vector<2x32xf32>, vector<32x32xf32>, vector<2x32xf32> -> vector<2x32xf32>
    %18 = vector.broadcast %2 : vector<1x32xf32> to vector<2x32xf32>
    %19 = arith.addf %17, %18 : vector<2x32xf32>
    %cst_12 = arith.constant 0.000000e+00 : f32
    %20 = vector.broadcast %cst_12 : f32 to vector<2x32xf32>
    %21 = arith.maximumf %19, %20 : vector<2x32xf32>
    %c0_13 = arith.constant 0 : index
    %c0_14 = arith.constant 0 : index
    %22 = vector.load %arg5[%c0_13, %c0_14] : memref<32x8xf32, #tpu.memory_space<vmem>>, vector<32x8xf32>
    %cst_15 = arith.constant dense<0.000000e+00> : vector<2x8xf32>
    %23 = tpu.matmul %21, %22, %cst_15 {dimension_numbers = #tpu.dot_dimension_numbers<[1], [0], [0], [1], [0, 0, 1, 1], [], []>} : vector<2x32xf32>, vector<32x8xf32>, vector<2x8xf32> -> vector<2x8xf32>
    %24 = vector.broadcast %3 : vector<1x8xf32> to vector<2x8xf32>
    %25 = arith.addf %23, %24 : vector<2x8xf32>
    %c0_16 = arith.constant 0 : index
    %c0_17 = arith.constant 0 : index
    %26 = vector.load %arg7[%c0_16, %c0_17] : memref<2x8xf32, #tpu.memory_space<vmem>>, vector<2x8xf32>
    tpu.vector_store %arg7[%c0_16, %c0_17], %25 {strides = array<i32>} : memref<2x8xf32, #tpu.memory_space<vmem>>, vector<2x8xf32>,
    return
  }
  func.func @transform_0(%arg0: i32) -> (i32, i32) {
    %c0_i32 = arith.constant 0 : i32
    %c0_i32_0 = arith.constant 0 : i32
    return %arg0, %c0_i32 : i32, i32
  }
  func.func @transform_1(%arg0: i32) -> (i32, i32) {
    %c0_i32 = arith.constant 0 : i32
    %c0_i32_0 = arith.constant 0 : i32
    return %arg0, %c0_i32 : i32, i32
  }
  func.func @transform_2(%arg0: i32) -> (i32, i32) {
    %c0_i32 = arith.constant 0 : i32
    %c0_i32_0 = arith.constant 0 : i32
    %c0_i32_1 = arith.constant 0 : i32
    return %c0_i32, %c0_i32_0 : i32, i32
  }
  func.func @transform_3(%arg0: i32) -> (i32, i32) {
    %c0_i32 = arith.constant 0 : i32
    %c0_i32_0 = arith.constant 0 : i32
    %c0_i32_1 = arith.constant 0 : i32
    return %c0_i32, %c0_i32_0 : i32, i32
  }
  func.func @transform_4(%arg0: i32) -> (i32, i32) {
    %c0_i32 = arith.constant 0 : i32
    %c0_i32_0 = arith.constant 0 : i32
    %c0_i32_1 = arith.constant 0 : i32
    return %c0_i32, %c0_i32_0 : i32, i32
  }
  func.func @transform_5(%arg0: i32) -> (i32, i32) {
    %c0_i32 = arith.constant 0 : i32
    %c0_i32_0 = arith.constant 0 : i32
    %c0_i32_1 = arith.constant 0 : i32
    return %c0_i32, %c0_i32_0 : i32, i32
  }
  func.func @transform_6(%arg0: i32) -> (i32, i32) {
    %c0_i32 = arith.constant 0 : i32
    %c0_i32_0 = arith.constant 0 : i32
    return %arg0, %c0_i32 : i32, i32
  }
}

</mosaic_0001>

<bundles_post_ra>
// kernel: policy_mlp_pallas.1
= control target key start
LH: loop header
LB: loop body
LE: loop exit
PB: predicated region body
PF: predicated region fallthrough
CT: control target
= control target key end

     0   :  { %11 = vsyncpa [#allocation3], 0  ;;  %s644_s0 = inlined_call_operand.vmem [shape: f32[2,12], index: 0, kind: input, shape index: {}]   ;;  %s645_s1 = inlined_call_operand.vmem [shape: f32[2,20], index: 1, kind: input, shape index: {}]   ;;  %s646_s2 = inlined_call_operand.vmem [shape: f32[32,32], index: 2, kind: input, shape index: {}]   ;;  %s647_s3 = inlined_call_operand.hbm [shape: f32[32,32], index: 3, kind: input, shape index: {}]   ;;  %s648_s4 = inlined_call_operand.vmem [shape: f32[32,8], index: 4, kind: input, shape index: {}]   ;;  %s649_s5 = inlined_call_operand.vmem [shape: f32[1,72], index: 5, kind: input, shape index: {}]   ;;  %s650_s6 = inlined_call_operand.hbm [shape: f32[2,8], index: 6, kind: output, shape index: {}]  }
   0x1   :  { %12 = vsyncpa [#allocation4], 0  ;;  %s534_s21 = smov [#allocation2]   ;;  %s486_s25 = scalar_lea.hbm %s647_s3, 512 }
   0x2   :  { %s24_s22 = sshll.u32 %s534_s21, 4  ;;  %p487_p0 = scmp.ne.s32.totalorder %s647_s3, %s486_s25  ;;  %s25_s22 = int_to_ptr.vmem [resolvable:$true] %s24_s22 }
   0x3   :  { %p490_p1 = scmp.lt.u32.totalorder %s486_s25, %s647_s3 }
   0x5   :  { %p492_p2 = pnand %p490_p1, %p487_p0 }
   0x7   :  { %495 = shalt.err (!%p492_p2)
}
   0x8   :  { %s496_s30 = scalar_lea.vmem %s25_s22, 512  ;;  %p501_p4 = scmp.lt.s32.totalorder %s25_s22, %s25_s22 }
   0x9   :  { %p497_p3 = scmp.ne.s32.totalorder %s25_s22, %s496_s30  ;;  %p502_p5 = scmp.lt.s32.totalorder %s496_s30, %s496_s30 }
   0xb   :  { %p503_p6 = por %p502_p5, %p501_p4 }
   0xd   :  { %p504_p7 = pnand %p503_p6, %p497_p3 }
   0xf   :  { %507 = shalt.err (!%p504_p7)
}
  0x10   :  { %s535_s7 = smov 128   ;;  %s536_s8 = smov 8  }
  0x11   :  { %30 = dma.hbm_to_vmem [thread:$0]  %s647_s3, 512, %s25_s22, [#allocation3], %s535_s7, %s535_s7, %s536_s8  }
  0x12   :  { %530 = dma.done.wait [#allocation3], 512  }
  0x13   :  { %531 = vsyncadd [#allocation3], 4294966784  ;;  %v537_v0 = vmov 0.0|0.0   ;;  %vm538_vm0 = vmmov 0   ;;  %v539_v1 = vmov 0.0   ;;  %v40_v2 = vld [vmem:[%s646_s2 + $0x8] sm:$0xff] }
  0x14   :  { %457 = vmatprep.subr.bf16.mxu0 %v537_v0  ;;  %460 = vmatprep.subr.bf16.mxu1 %v537_v0  ;;  %v41_v3 = vld [vmem:[%s646_s2 + $0x10] sm:$0xff]  ;;  %v42_v4 = vld [vmem:[%s646_s2 + $0x18] sm:$0xff]  ;;  %vm48_vm1 = vcmask 1043456   ;;  %v49_v5 = vrot.slane %v40_v2, 4  ;;  %v39_v8 = vld [vmem:[%s646_s2] sm:$0xff]  ;;  %vm540_vm2 = vmmov 1  }
  0x15   :  { %432 = vmatprep.mubr.msk.f32.mxu1 %vm538_vm0, %v539_v1  ;;  %425 = vmatprep.mubr.msk.f32.mxu0 %vm538_vm0, %v539_v1  ;;  %v50_v6 = vrot.slane %v41_v3, 4  ;;  %v52_v7 = vrot.slane %v42_v4, 4  ;;  %vm462_vm3 = vmpackc.low %vm48_vm1, %vm540_vm2  ;;  %v461_v9 = vpack.c.bf16 %v40_v2, %v39_v8  ;;  %v43_v13 = vld [vmem:[%s644_s0] sm:$0x3]  ;;  %vm132_vm4 = vcmask 97280   ;;  %v217_v16 = vld [vmem:[#allocation2 + $0x8] sm:$0xff] }
  0x16   :  { %v44_v14 = vld [vmem:[%s645_s1] sm:$0x3]  ;;  %vm56_vm5 = vcmask 162816   ;;  %v218_v18 = vld [vmem:[#allocation2 + $0x10] sm:$0xff]  ;;  %v219_v19 = vld [vmem:[#allocation2 + $0x18] sm:$0xff]  ;;  %s541_s25 = smov 96  }
  0x17   :  { %v51_v10 = vsel %vm48_vm1, %v49_v5, %v50_v6  ;;  %v53_v11 = vsel %vm48_vm1, %v50_v6, %v52_v7  ;;  %463 = vmatpush3.bf16.msk.msra.mxu1 %vm462_vm3, %v461_v9  ;;  %v216_v15 = vld [vmem:[#allocation2] sm:$0xff]  ;;  %v468_v20 = vpack.c.bf16 %v219_v19, %v218_v18  ;;  %v299_v23 = vld [vmem:[%s648_s4 + $0x8] sm:$0xff]  ;;  %vm223_vm6 = vcmask 261120   ;;  %v300_v32 = vld [vmem:[%s648_s4 + $0x10] sm:$0xff]  ;;  %s542_s29 = smov 64   ;;  %s543_s30 = smov [#allocation5]  }
  0x18   :  { %v458_v12 = vpack.c.bf16 %v53_v11, %v51_v10  ;;  %464 = vmatprep.subr.bf16.mxu1 %v537_v0  ;;  %v465_v17 = vpack.c.bf16 %v217_v16, %v216_v15  ;;  %v399_v21 = vld [vmem:[%s649_s5] ss:$0 sm:$0xff]  ;;  %v301_v33 = vld [vmem:[%s648_s4 + $0x18] sm:$0xff]  ;;  %s386_s7 = sshll.u32 %s543_s30, 4  ;;  %vm378_vm7 = vcmask 58368   ;;  %s387_s7 = int_to_ptr.vmem [resolvable:$true] %s386_s7 }
  0x19   :  { %v298_v22 = vld [vmem:[%s648_s4] sm:$0xff]  ;;  %220 = vrot.lane.b32.xlu0 %v399_v21, %s541_s25  ;;  %v474_v34 = vpack.c.bf16 %v301_v33, %v300_v32  ;;  %s508_s4 = scalar_lea.vmem %s387_s7, 32  ;;  %p513_p9 = scmp.lt.s32.totalorder %s387_s7, %s387_s7 }
  0x1a   :  { %459 = vmatpush3.bf16.msra.mxu0 %v458_v12  ;;  %433 = vmatmul.mubr.msk.f32.vlgmr.msra.gmra.mrb[0].mxu1 %vm132_vm4, %v43_v13  ;;  %v471_v24 = vpack.c.bf16 %v299_v23, %v298_v22  ;;  %p509_p8 = scmp.ne.s32.totalorder %s387_s7, %s508_s4  ;;  %p514_p10 = scmp.lt.s32.totalorder %s508_s4, %s508_s4 }
  0x1b   :  { %423 = vmatprep.subr.mxu0 %v539_v1  ;;  %443 = vmatprep.mubr.msk.f32.mxu1 %vm538_vm0, %v539_v1 }
  0x1c   :  { %466 = vmatpush3.bf16.msra.mxu1 %v465_v17  ;;  %p515_p11 = por %p514_p10, %p513_p9 }
  0x1d   :  { %467 = vmatprep.subr.bf16.mxu1 %v537_v0  ;;  %302 = vrot.lane.b32.xlu0 %v399_v21, %s542_s29 }
  0x1e   :  { %424 = vmatpush3.msk.msra.mxu0 %vm48_vm1, %v52_v7  ;;  %p516_p12 = pnand %p515_p11, %p509_p8 }
  0x1f   :  { %426 = vmatmul.mubr.msk.f32.vlgmr.msra.gmra.mrb[0].mxu0 %vm56_vm5, %v44_v14  ;;  %470 = vmatprep.subr.bf16.mxu0 %v537_v0 }
  0x20   :  { %454 = vmatprep.mubr.msk.f32.mxu0 %vm538_vm0, %v539_v1  ;;  %469 = vmatpush3.bf16.msra.mxu1 %v468_v20 }
  0x21   :  { %472 = vmatpush3.bf16.msra.mxu0 %v471_v24 }
  0x22   :  { %473 = vmatprep.subr.bf16.mxu0 %v537_v0 }
  0x25   :  { %475 = vmatpush3.bf16.msra.mxu0 %v474_v34 }
  0x8b   :  { %v221_v35 = vpop.permute.xlu0 %220 }
  0x8f   :  { %v303_v40 = vpop.permute.xlu0 %302 }
  0xed   :  { %v204_v25 = vpop.f32.mrb[0].mxu1 }
  0xee   :  { %v434_v26 = vpop.f32.mrb[1].mxu1 }
  0xf2   :  { %v128_v27 = vpop.f32.mrb[0].mxu0 }
  0xf3   :  { %v205_v28 = vadd.f32 %v204_v25, %v128_v27  ;;  %v427_v29 = vpop.f32.mrb[1].mxu0 }
  0xf5   :  { %v214_v30 = vadd.f32 %v399_v21, %v205_v28 }
  0xf7   :  { %v215_v31 = vmax.f32 %v214_v30, 0.0 }
  0xf9   :  { %444 = vmatmul.mubr.msk.f32.vlgmr.msra.gmra.mrb[2].mxu1 %vm223_vm6, %v215_v31 }
 0x1cc   :  { %v293_v36 = vpop.f32.mrb[2].mxu1 }
 0x1cd   :  { %v294_v37 = vadd.f32 %v293_v36, %v221_v35  ;;  %v445_v38 = vpop.f32.mrb[3].mxu1 }
 0x1cf   :  { %v297_v39 = vmax.f32 %v294_v37, 0.0 }
 0x1d1   :  { %455 = vmatmul.mubr.msk.f32.vlgmr.msra.gmra.mrb[2].mxu0 %vm223_vm6, %v297_v39 }
 0x2a4   :  { %v374_v41 = vpop.f32.mrb[2].mxu0 }
 0x2a5   :  { %v375_v42 = vadd.f32 %v374_v41, %v303_v40  ;;  %v456_v43 = vpop.f32.mrb[3].mxu0 }
 0x2a7   :  { %379 = vst.msk [vmem:[#allocation5] sm:$0x3] %vm378_vm7, %v375_v42 }
 0x2a8   :  { %519 = shalt.err (!%p516_p12)
}
 0x2a9   :  { %s520_s10 = scalar_lea.hbm %s650_s6, 32 }
 0x2aa   :  { %p521_p13 = scmp.ne.s32.totalorder %s650_s6, %s520_s10  ;;  %p524_p0 = scmp.lt.u32.totalorder %s520_s10, %s650_s6 }
 0x2ac   :  { %p526_p1 = pnand %p524_p0, %p521_p13 }
 0x2ae   :  { %529 = shalt.err (!%p526_p1)
}
 0x2af   :  { %389 = dma.vmem_to_hbm [thread:$0]  %s387_s7, 32, %s650_s6, [#allocation4]  }
 0x2b0   :  { %532 = dma.done.wait [#allocation4], 32  }
 0x2b1   :  { %533 = vsyncadd [#allocation4], 4294967264 }
 0x2b2   :  { %393 = vsyncpa [#allocation3], 1 }
 0x2b3   :  { %394 = vsyncpa [#allocation4], 1 }

</bundles_post_ra>
